<compile_context>
chip_gen: v5e
topology: v5e:2x2
jax: 0.10.0
libtpu: 0.0.40
codegen_flags: <defaults>
</compile_context>

<pallas_src>
import functools

import jax
import jax.numpy as jnp
from jax import lax
from jax.experimental import pallas as pl
from jax.experimental.pallas import tpu as pltpu

BN_EPS = 1e-5
_LANE = 128


def _round_up(x, m):
    return ((x + m - 1) // m) * m


def _pos_embed_kernel(x_ref, w1_ref, gamma_ref, beta_ref, w2_ref, b2_ref,
                      o_ref, sum_ref, sumsq_ref, scale_ref, shift_ref,
                      *, n_rows, tile_n, mask_rows):
    # x_ref:     (tile_n, C_in)
    # w1_ref:    (C_in, Fp)
    # gamma_ref: (1, Fp)      beta_ref: (1, Fp)
    # w2_ref:    (Fp, Fp)     b2_ref:   (1, Fp)
    # o_ref:     (tile_n, Fp)
    # scratch:   sum/sumsq/scale/shift each (1, Fp) f32, persistent across grid.
    p = pl.program_id(0)          # 0 = batch-stats pass, 1 = normalize+matmul2
    i = pl.program_id(1)          # N-tile index
    n_tiles = pl.num_programs(1)

    # Linear-1 on the MXU (recomputed in both passes; K = C_in is tiny).
    # b1 is intentionally omitted: it cancels exactly under batch-stat BN.
    h = jnp.dot(x_ref[...], w1_ref[...], preferred_element_type=jnp.float32)

    @pl.when(p == 0)
    def _stats_pass():
        @pl.when(i == 0)
        def _init():
            sum_ref[...] = jnp.zeros_like(sum_ref)
            sumsq_ref[...] = jnp.zeros_like(sumsq_ref)

        if mask_rows:
            # Defensive: exclude zero-padded rows from the batch statistics.
            row = i * tile_n + lax.broadcasted_iota(jnp.int32, h.shape, 0)
            hm = jnp.where(row < n_rows, h, 0.0)
        else:
            hm = h
        sum_ref[...] += jnp.sum(hm, axis=0, keepdims=True)
        sumsq_ref[...] += jnp.sum(hm * hm, axis=0, keepdims=True)

        @pl.when(i == n_tiles - 1)
        def _finalize():
            inv_n = 1.0 / n_rows
            mean = sum_ref[...] * inv_n
            var = sumsq_ref[...] * inv_n - mean * mean
            inv_std = lax.rsqrt(var + BN_EPS)
            scale = gamma_ref[...] * inv_std
            scale_ref[...] = scale
            shift_ref[...] = beta_ref[...] - mean * scale

    @pl.when(p == 1)
    def _apply_pass():
        # Fused BN (scale/shift) + ReLU, then Linear-2 on the MXU.
        hn = jnp.maximum(h * scale_ref[...] + shift_ref[...], 0.0)
        o_ref[...] = (jnp.dot(hn, w2_ref[...],
                              preferred_element_type=jnp.float32)
                      + b2_ref[...])


def position_embedding_learned(xyz, params, *, tile_n=512):
    """Forward of PositionEmbeddingLearned. xyz: (N, C_in) f32 -> (N, F) f32."""
    w1 = params["w1"]
    gamma = params["gamma"]
    beta = params["beta"]
    w2 = params["w2"]
    b2 = params["b2"]
    # params["b1"] is deliberately unused by the kernel: with training-mode
    # BatchNorm the Linear-1 bias cancels exactly in the centering step.

    N, c_in = xyz.shape
    F = w1.shape[1]

    # Lane-dense feature dim: pad F to a multiple of 128 (unmasked stores).
    f_pad = _round_up(F, _LANE)
    df = f_pad - F

    # Row tiling over N (sublane multiple of 8).
    tile = min(tile_n, _round_up(N, 8))
    n_pad = _round_up(N, tile)
    n_tiles = n_pad // tile

    xyz_p = jnp.pad(xyz, ((0, n_pad - N), (0, 0))) if n_pad != N else xyz
    w1_p = jnp.pad(w1, ((0, 0), (0, df))) if df else w1
    gamma_p = jnp.pad(gamma, ((0, 0), (0, df))) if df else gamma
    beta_p = jnp.pad(beta, ((0, 0), (0, df))) if df else beta
    w2_p = jnp.pad(w2, ((0, df), (0, df))) if df else w2
    b2_p = jnp.pad(b2, ((0, 0), (0, df))) if df else b2

    kernel = functools.partial(
        _pos_embed_kernel,
        n_rows=N, tile_n=tile, mask_rows=(n_pad != N))

    resident = lambda shape: pl.BlockSpec(shape, lambda p, i: (0, 0))

    out_p = pl.pallas_call(
        kernel,
        out_shape=jax.ShapeDtypeStruct((n_pad, f_pad), jnp.float32),
        grid_spec=pltpu.PrefetchScalarGridSpec(
            num_scalar_prefetch=0,
            grid=(2, n_tiles),            # (pass, N-tile)
            in_specs=[
                pl.BlockSpec((tile, c_in), lambda p, i: (i, 0)),   # xyz tile
                resident((c_in, f_pad)),                           # w1
                resident((1, f_pad)),                              # gamma
                resident((1, f_pad)),                              # beta
                resident((f_pad, f_pad)),                          # w2
                resident((1, f_pad)),                              # b2
            ],
            # Pinned to block 0 during pass 0 (p == 0) so no stale tile is
            # written back to HBM; pass 1 writes each tile exactly once.
            out_specs=pl.BlockSpec((tile, f_pad), lambda p, i: (p * i, 0)),
            scratch_shapes=[pltpu.VMEM((1, f_pad), jnp.float32)] * 4,
        ),
        compiler_params=pltpu.CompilerParams(
            dimension_semantics=("arbitrary", "arbitrary"),
            vmem_limit_bytes=32 * 1024 * 1024,
        ),
    )(xyz_p, w1_p, gamma_p, beta_p, w2_p, b2_p)

    return out_p[:N, :F]


def init_params(key, input_channel, num_pos_feats):
    """Deterministic parameter init (synthetic; not a checkpoint load)."""
    k1, k2, k3, k4 = jax.random.split(key, 4)
    # PyTorch Linear default init: U(-1/sqrt(fan_in), 1/sqrt(fan_in))
    lim1 = 1.0 / jnp.sqrt(input_channel)
    lim2 = 1.0 / jnp.sqrt(num_pos_feats)
    params = {
        # Stored transposed relative to torch (so kernel does x @ w).
        "w1": jax.random.uniform(k1, (input_channel, num_pos_feats),
                                 jnp.float32, -lim1, lim1),
        # b1 exists in the module but is mathematically cancelled by BN;
        # kept here only so the reference can include it.
        "b1": jax.random.uniform(k2, (1, num_pos_feats),
                                 jnp.float32, -lim1, lim1),
        "gamma": jnp.ones((1, num_pos_feats), jnp.float32),   # BN weight
        "beta": jnp.zeros((1, num_pos_feats), jnp.float32),   # BN bias
        "w2": jax.random.uniform(k3, (num_pos_feats, num_pos_feats),
                                 jnp.float32, -lim2, lim2),
        "b2": jax.random.uniform(k4, (1, num_pos_feats),
                                 jnp.float32, -lim2, lim2),
    }
    return params


def _reference(xyz, p):
    """Pure-JAX reference for correctness checking (includes b1)."""
    h = xyz @ p["w1"] + p["b1"]
    mean = h.mean(axis=0, keepdims=True)
    var = ((h - mean) ** 2).mean(axis=0, keepdims=True)
    h = (h - mean) / jnp.sqrt(var + BN_EPS) * p["gamma"] + p["beta"]
    h = jnp.maximum(h, 0.0)
    return h @ p["w2"] + p["b2"]


if __name__ == "__main__":
    key = jax.random.PRNGKey(0)
    k_x, k_p = jax.random.split(key)

    # Small shapes consistent with the module: N points, xyz-like coords,
    # 32 positional features.
    N, C_IN, F = 200, 4, 32
    xyz = jax.random.normal(k_x, (N, C_IN), jnp.float32)
    params = init_params(k_p, C_IN, F)

    # tile_n=64 exercises the multi-tile two-pass path (and row masking) even
    # at this small N; real DSVT point counts would use the default tile_n=512.
    out = position_embedding_learned(xyz, params, tile_n=64)
    out = jax.block_until_ready(out)

    ref = _reference(xyz, params)
    assert out.shape == (N, F)
    assert jnp.allclose(out, ref, atol=1e-4, rtol=1e-4), "mismatch vs reference"

    print("KERNEL_OK")
</pallas_src>

<mosaic_0001>
module attributes {stable_mosaic.version = 11 : i64} {
  func.func @_pos_embed_kernel(%arg0: i32, %arg1: i32, %arg2: memref<64x4xf32, #tpu.memory_space<vmem>>, %arg3: memref<4x128xf32, #tpu.memory_space<vmem>>, %arg4: memref<1x128xf32, #tpu.memory_space<vmem>>, %arg5: memref<1x128xf32, #tpu.memory_space<vmem>>, %arg6: memref<128x128xf32, #tpu.memory_space<vmem>>, %arg7: memref<1x128xf32, #tpu.memory_space<vmem>>, %arg8: memref<64x128xf32, #tpu.memory_space<vmem>>, %arg9: memref<1x128xf32, #tpu.memory_space<vmem>>, %arg10: memref<1x128xf32, #tpu.memory_space<vmem>>, %arg11: memref<1x128xf32, #tpu.memory_space<vmem>>, %arg12: memref<1x128xf32, #tpu.memory_space<vmem>>) attributes {dimension_semantics = [#tpu.dimension_semantics<arbitrary>, #tpu.dimension_semantics<arbitrary>], iteration_bounds = array<i64: 2, 4>, scalar_prefetch = 0 : i64, scratch_operands = 4 : i64, tpu.core_type = #tpu.core_type<tc>, window_params = [{transform_indices = @transform_0, window_bounds = array<i64: 64, 4>}, {pipeline_mode = #tpu.pipeline_mode<synchronous>, transform_indices = @transform_1, window_bounds = array<i64: 4, 128>}, {pipeline_mode = #tpu.pipeline_mode<synchronous>, transform_indices = @transform_2, window_bounds = array<i64: 1, 128>}, {pipeline_mode = #tpu.pipeline_mode<synchronous>, transform_indices = @transform_3, window_bounds = array<i64: 1, 128>}, {pipeline_mode = #tpu.pipeline_mode<synchronous>, transform_indices = @transform_4, window_bounds = array<i64: 128, 128>}, {pipeline_mode = #tpu.pipeline_mode<synchronous>, transform_indices = @transform_5, window_bounds = array<i64: 1, 128>}, {transform_indices = @transform_6, window_bounds = array<i64: 64, 128>}]} {
    %c0 = arith.constant 0 : index
    %c0_0 = arith.constant 0 : index
    %0 = vector.load %arg2[%c0, %c0_0] : memref<64x4xf32, #tpu.memory_space<vmem>>, vector<64x4xf32>
    %c0_1 = arith.constant 0 : index
    %c0_2 = arith.constant 0 : index
    %1 = vector.load %arg3[%c0_1, %c0_2] : memref<4x128xf32, #tpu.memory_space<vmem>>, vector<4x128xf32>
    %cst = arith.constant dense<0.000000e+00> : vector<64x128xf32>
    %2 = tpu.matmul %0, %1, %cst {dimension_numbers = #tpu.dot_dimension_numbers<[1], [0], [0], [1], [0, 0, 1, 1], [], []>} : vector<64x4xf32>, vector<4x128xf32>, vector<64x128xf32> -> vector<64x128xf32>
    %c0_i32 = arith.constant 0 : i32
    %3 = arith.cmpi eq, %arg0, %c0_i32 : i32
    %4 = arith.extui %3 : i1 to i32
    %c0_i32_3 = arith.constant 0 : i32
    %5 = arith.cmpi ne, %4, %c0_i32_3 : i32
    scf.if %5 {
      %c0_i32_5 = arith.constant 0 : i32
      %9 = arith.cmpi eq, %arg1, %c0_i32_5 : i32
      %10 = arith.extui %9 : i1 to i32
      %c0_i32_6 = arith.constant 0 : i32
      %11 = arith.cmpi ne, %10, %c0_i32_6 : i32
      scf.if %11 {
        %cst_19 = arith.constant 0.000000e+00 : f32
        %34 = vector.broadcast %cst_19 : f32 to vector<1x128xf32>
        %c0_20 = arith.constant 0 : index
        %c0_21 = arith.constant 0 : index
        %35 = vector.load %arg9[%c0_20, %c0_21] : memref<1x128xf32, #tpu.memory_space<vmem>>, vector<1x128xf32>
        tpu.vector_store %arg9[%c0_20, %c0_21], %34 {strides = array<i32>} : memref<1x128xf32, #tpu.memory_space<vmem>>, vector<1x128xf32>,
        %cst_22 = arith.constant 0.000000e+00 : f32
        %36 = vector.broadcast %cst_22 : f32 to vector<1x128xf32>
        %c0_23 = arith.constant 0 : index
        %c0_24 = arith.constant 0 : index
        %37 = vector.load %arg10[%c0_23, %c0_24] : memref<1x128xf32, #tpu.memory_space<vmem>>, vector<1x128xf32>
        tpu.vector_store %arg10[%c0_23, %c0_24], %36 {strides = array<i32>} : memref<1x128xf32, #tpu.memory_space<vmem>>, vector<1x128xf32>,
      } else {
      }
      %c64_i32 = arith.constant 64 : i32
      %12 = arith.muli %arg1, %c64_i32 : i32
      %13 = tpu.iota {dimensions = array<i32: 0>} : vector<64x128xi32>
      %14 = vector.broadcast %12 : i32 to vector<64x128xi32>
      %15 = arith.addi %14, %13 : vector<64x128xi32>
      %c200_i32 = arith.constant 200 : i32
      %16 = vector.broadcast %c200_i32 : i32 to vector<64x128xi32>
      %17 = arith.cmpi slt, %15, %16 : vector<64x128xi32>
      %cst_7 = arith.constant 0.000000e+00 : f32
      %18 = vector.broadcast %cst_7 : f32 to vector<64x128xf32>
      %19 = arith.select %17, %2, %18 : vector<64x128xi1>, vector<64x128xf32>
      %c0_8 = arith.constant 0 : index
      %c0_9 = arith.constant 0 : index
      %20 = vector.load %arg9[%c0_8, %c0_9] : memref<1x128xf32, #tpu.memory_space<vmem>>, vector<1x128xf32>
      %cst_10 = arith.constant dense<0.000000e+00> : vector<128xf32>
      %21 = vector.multi_reduction <add>, %19, %cst_10 [0] : vector<64x128xf32> to vector<128xf32>
      %22 = vector.shape_cast %21 : vector<128xf32> to vector<1x128xf32>
      %23 = arith.addf %20, %22 : vector<1x128xf32>
      %c0_11 = arith.constant 0 : index
      %c0_12 = arith.constant 0 : index
      %24 = vector.load %arg9[%c0_11, %c0_12] : memref<1x128xf32, #tpu.memory_space<vmem>>, vector<1x128xf32>
      tpu.vector_store %arg9[%c0_11, %c0_12], %23 {strides = array<i32>} : memref<1x128xf32, #tpu.memory_space<vmem>>, vector<1x128xf32>,
      %c0_13 = arith.constant 0 : index
      %c0_14 = arith.constant 0 : index
      %25 = vector.load %arg10[%c0_13, %c0_14] : memref<1x128xf32, #tpu.memory_space<vmem>>, vector<1x128xf32>
      %26 = arith.mulf %19, %19 : vector<64x128xf32>
      %cst_15 = arith.constant dense<0.000000e+00> : vector<128xf32>
      %27 = vector.multi_reduction <add>, %26, %cst_15 [0] : vector<64x128xf32> to vector<128xf32>
      %28 = vector.shape_cast %27 : vector<128xf32> to vector<1x128xf32>
      %29 = arith.addf %25, %28 : vector<1x128xf32>
      %c0_16 = arith.constant 0 : index
      %c0_17 = arith.constant 0 : index
      %30 = vector.load %arg10[%c0_16, %c0_17] : memref<1x128xf32, #tpu.memory_space<vmem>>, vector<1x128xf32>
      tpu.vector_store %arg10[%c0_16, %c0_17], %29 {strides = array<i32>} : memref<1x128xf32, #tpu.memory_space<vmem>>, vector<1x128xf32>,
      %c3_i32 = arith.constant 3 : i32
      %31 = arith.cmpi eq, %arg1, %c3_i32 : i32
      %32 = arith.extui %31 : i1 to i32
      %c0_i32_18 = arith.constant 0 : i32
      %33 = arith.cmpi ne, %32, %c0_i32_18 : i32
      scf.if %33 {
        %c0_19 = arith.constant 0 : index
        %c0_20 = arith.constant 0 : index
        %34 = vector.load %arg9[%c0_19, %c0_20] : memref<1x128xf32, #tpu.memory_space<vmem>>, vector<1x128xf32>
        %cst_21 = arith.constant 5.000000e-03 : f32
        %35 = vector.broadcast %cst_21 : f32 to vector<1x128xf32>
        %36 = arith.mulf %34, %35 : vector<1x128xf32>
        %c0_22 = arith.constant 0 : index
        %c0_23 = arith.constant 0 : index
        %37 = vector.load %arg10[%c0_22, %c0_23] : memref<1x128xf32, #tpu.memory_space<vmem>>, vector<1x128xf32>
        %cst_24 = arith.constant 5.000000e-03 : f32
        %38 = vector.broadcast %cst_24 : f32 to vector<1x128xf32>
        %39 = arith.mulf %37, %38 : vector<1x128xf32>
        %40 = arith.mulf %36, %36 : vector<1x128xf32>
        %41 = arith.subf %39, %40 : vector<1x128xf32>
        %cst_25 = arith.constant 9.99999974E-6 : f32
        %42 = vector.broadcast %cst_25 : f32 to vector<1x128xf32>
        %43 = arith.addf %41, %42 : vector<1x128xf32>
        %44 = math.rsqrt %43 : vector<1x128xf32>
        %c0_26 = arith.constant 0 : index
        %c0_27 = arith.constant 0 : index
        %45 = vector.load %arg4[%c0_26, %c0_27] : memref<1x128xf32, #tpu.memory_space<vmem>>, vector<1x128xf32>
        %46 = arith.mulf %45, %44 : vector<1x128xf32>
        %c0_28 = arith.constant 0 : index
        %c0_29 = arith.constant 0 : index
        %47 = vector.load %arg11[%c0_28, %c0_29] : memref<1x128xf32, #tpu.memory_space<vmem>>, vector<1x128xf32>
        tpu.vector_store %arg11[%c0_28, %c0_29], %46 {strides = array<i32>} : memref<1x128xf32, #tpu.memory_space<vmem>>, vector<1x128xf32>,
        %c0_30 = arith.constant 0 : index
        %c0_31 = arith.constant 0 : index
        %48 = vector.load %arg5[%c0_30, %c0_31] : memref<1x128xf32, #tpu.memory_space<vmem>>, vector<1x128xf32>
        %49 = arith.mulf %36, %46 : vector<1x128xf32>
        %50 = arith.subf %48, %49 : vector<1x128xf32>
        %c0_32 = arith.constant 0 : index
        %c0_33 = arith.constant 0 : index
        %51 = vector.load %arg12[%c0_32, %c0_33] : memref<1x128xf32, #tpu.memory_space<vmem>>, vector<1x128xf32>
        tpu.vector_store %arg12[%c0_32, %c0_33], %50 {strides = array<i32>} : memref<1x128xf32, #tpu.memory_space<vmem>>, vector<1x128xf32>,
      } else {
      }
    } else {
    }
    %c1_i32 = arith.constant 1 : i32
    %6 = arith.cmpi eq, %arg0, %c1_i32 : i32
    %7 = arith.extui %6 : i1 to i32
    %c0_i32_4 = arith.constant 0 : i32
    %8 = arith.cmpi ne, %7, %c0_i32_4 : i32
    scf.if %8 {
      %c0_5 = arith.constant 0 : index
      %c0_6 = arith.constant 0 : index
      %9 = vector.load %arg11[%c0_5, %c0_6] : memref<1x128xf32, #tpu.memory_space<vmem>>, vector<1x128xf32>
      %10 = vector.broadcast %9 : vector<1x128xf32> to vector<64x128xf32>
      %11 = arith.mulf %2, %10 : vector<64x128xf32>
      %c0_7 = arith.constant 0 : index
      %c0_8 = arith.constant 0 : index
      %12 = vector.load %arg12[%c0_7, %c0_8] : memref<1x128xf32, #tpu.memory_space<vmem>>, vector<1x128xf32>
      %13 = vector.broadcast %12 : vector<1x128xf32> to vector<64x128xf32>
      %14 = arith.addf %11, %13 : vector<64x128xf32>
      %cst_9 = arith.constant 0.000000e+00 : f32
      %15 = vector.broadcast %cst_9 : f32 to vector<64x128xf32>
      %16 = arith.maximumf %14, %15 : vector<64x128xf32>
      %c0_10 = arith.constant 0 : index
      %c0_11 = arith.constant 0 : index
      %17 = vector.load %arg6[%c0_10, %c0_11] : memref<128x128xf32, #tpu.memory_space<vmem>>, vector<128x128xf32>
      %cst_12 = arith.constant dense<0.000000e+00> : vector<64x128xf32>
      %18 = tpu.matmul %16, %17, %cst_12 {dimension_numbers = #tpu.dot_dimension_numbers<[1], [0], [0], [1], [0, 0, 1, 1], [], []>} : vector<64x128xf32>, vector<128x128xf32>, vector<64x128xf32> -> vector<64x128xf32>
      %c0_13 = arith.constant 0 : index
      %c0_14 = arith.constant 0 : index
      %19 = vector.load %arg7[%c0_13, %c0_14] : memref<1x128xf32, #tpu.memory_space<vmem>>, vector<1x128xf32>
      %20 = vector.broadcast %19 : vector<1x128xf32> to vector<64x128xf32>
      %21 = arith.addf %18, %20 : vector<64x128xf32>
      %c0_15 = arith.constant 0 : index
      %c0_16 = arith.constant 0 : index
      %22 = vector.load %arg8[%c0_15, %c0_16] : memref<64x128xf32, #tpu.memory_space<vmem>>, vector<64x128xf32>
      tpu.vector_store %arg8[%c0_15, %c0_16], %21 {strides = array<i32>} : memref<64x128xf32, #tpu.memory_space<vmem>>, vector<64x128xf32>,
    } else {
    }
    return
  }
  func.func @transform_0(%arg0: i32, %arg1: i32) -> (i32, i32) {
    %c0_i32 = arith.constant 0 : i32
    %c0_i32_0 = arith.constant 0 : i32
    return %arg1, %c0_i32 : i32, i32
  }
  func.func @transform_1(%arg0: i32, %arg1: i32) -> (i32, i32) {
    %c0_i32 = arith.constant 0 : i32
    %c0_i32_0 = arith.constant 0 : i32
    %c0_i32_1 = arith.constant 0 : i32
    return %c0_i32, %c0_i32_0 : i32, i32
  }
  func.func @transform_2(%arg0: i32, %arg1: i32) -> (i32, i32) {
    %c0_i32 = arith.constant 0 : i32
    %c0_i32_0 = arith.constant 0 : i32
    %c0_i32_1 = arith.constant 0 : i32
    return %c0_i32, %c0_i32_0 : i32, i32
  }
  func.func @transform_3(%arg0: i32, %arg1: i32) -> (i32, i32) {
    %c0_i32 = arith.constant 0 : i32
    %c0_i32_0 = arith.constant 0 : i32
    %c0_i32_1 = arith.constant 0 : i32
    return %c0_i32, %c0_i32_0 : i32, i32
  }
  func.func @transform_4(%arg0: i32, %arg1: i32) -> (i32, i32) {
    %c0_i32 = arith.constant 0 : i32
    %c0_i32_0 = arith.constant 0 : i32
    %c0_i32_1 = arith.constant 0 : i32
    return %c0_i32, %c0_i32_0 : i32, i32
  }
  func.func @transform_5(%arg0: i32, %arg1: i32) -> (i32, i32) {
    %c0_i32 = arith.constant 0 : i32
    %c0_i32_0 = arith.constant 0 : i32
    %c0_i32_1 = arith.constant 0 : i32
    return %c0_i32, %c0_i32_0 : i32, i32
  }
  func.func @transform_6(%arg0: i32, %arg1: i32) -> (i32, i32) {
    %0 = arith.muli %arg0, %arg1 : i32
    %c0_i32 = arith.constant 0 : i32
    %c0_i32_0 = arith.constant 0 : i32
    return %0, %c0_i32 : i32, i32
  }
}

</mosaic_0001>

<bundles_post_ra>
// kernel: tpu_custom_call.1
= control target key start
LH: loop header
LB: loop body
LE: loop exit
PB: predicated region body
PF: predicated region fallthrough
CT: control target
= control target key end

     0   :  { %s1189_s0 = inlined_call_operand.vmem [shape: f32[256,4], index: 0, kind: input, shape index: {}]   ;;  %s1190_s1 = inlined_call_operand.vmem [shape: f32[4,128], index: 1, kind: input, shape index: {}]   ;;  %s1191_s2 = inlined_call_operand.vmem [shape: f32[1,128], index: 2, kind: input, shape index: {}]   ;;  %s1192_s3 = inlined_call_operand.vmem [shape: f32[1,128], index: 3, kind: input, shape index: {}]   ;;  %s1193_s4 = inlined_call_operand.vmem [shape: f32[128,128], index: 4, kind: input, shape index: {}]   ;;  %s1194_s5 = inlined_call_operand.vmem [shape: f32[1,128], index: 5, kind: input, shape index: {}]   ;;  %s1195_s6 = inlined_call_operand.hbm [shape: f32[256,128], index: 6, kind: output, shape index: {}]  }
   0x1   :  { %1196 = sst [smem:[#allocation9_spill]] %s1189_s0 }
   0x2   :  { %1197 = sst [smem:[#allocation10_spill]] %s1190_s1 }
   0x3   :  { %11 = vsyncpa [#allocation7], 0 }
   0x4   :  { %13 = vsyncpa [#allocation7 + $0x1], 0  ;;  %s947_s21 = smov 0   ;;  %s949_s22 = smov 0  }
   0x5   :  { %s951_s23 = smov 0   ;;  %s953_s24 = smov 0  }
   0x6   :  { %s955_s25 = smov 0   ;;  %s957_s26 = smov 0  }
   0x7   :  { %s959_s27 = smov 0   ;;  %s961_s28 = smov 0  }
   0x8 LB: > { %s655_s29 = sadd.s32 4294967295, %s907_s28   ;;  %s656_s30 = sadd.s32 4294967294, %s907_s28   ;;  %s907_s28 = sphi %s961_s28, %s19_s28   ;;  %s903_s27 = sphi %s959_s27, %s1208_s27   ;;  %s899_s26 = sphi %s957_s26, %s1207_s26   ;;  %s895_s25 = sphi %s955_s25, %s1206_s25   ;;  %s891_s24 = sphi %s953_s24, %s1205_s24   ;;  %s887_s23 = sphi %s951_s23, %s1204_s23   ;;  %s883_s22 = sphi %s949_s22, %s1203_s22   ;;  %s879_s21 = sphi %s947_s21, %s1202_s21  }
   0x9   : > { %s28_s7 = sadd.s32 1, %s899_s26  ;;  %s31_s8 = sadd.s32 1, %s903_s27 }
   0xa   : > { %p29_p0 = scmp.ge.s32.totalorder %s28_s7, 4  ;;  %s166_s9 = smul.u32 %s899_s26, %s903_s27 }
   0xb   : > { %p181_p1 = scmp.ne.s32.totalorder %s887_s23, %s883_s22  ;;  %p182_p2 = scmp.eq.s32.totalorder %s655_s29, 7 }
   0xc   : > { %s1210_s7 = smov (%p29_p0, %s28_s7), 0  ;;  %s1212_s8 = smov (!%p29_p0, %s31_s8), %s903_s27 }
   0xd   : > { %p187_p3 = scmp.ne.s32.totalorder %s883_s22, %s879_s21  ;;  %p33_p4 = scmp.ge.s32.totalorder %s1212_s8, 2 }
   0xe   : > { %p188_p5 = scmp.eq.s32.totalorder %s656_s30, 7  ;;  %p1000_p6 = por %p182_p2, %p181_p1 }
   0xf   : > { %p659_p7 = scmp.ge.s32.totalorder %s907_s28, 1  ;;  %s1214_s8 = smov (%p33_p4, %s1212_s8), 0 }
  0x10   : > { %p1007_p8 = por %p188_p5, %p187_p3  ;;  %p230_p9 = scmp.lt.s32.totalorder %s907_s28, 9 }
  0x11   : > { %s167_s12 = smul.u32 %s1214_s8, %s1210_s7  ;;  %s171_s14 = sadd.s32 1, %s887_s23 }
  0x12   : > { %p231_p10 = pnand %p659_p7, %p230_p9 }
  0x13   : > { %s168_s13 = ssub.s32 %s166_s9, %s167_s12  ;;  %s1200_s1 = sld [smem:[#allocation10_spill]] (!%p231_p10) }
  0x14   : > { %p169_p11 = scmp.eq.s32.totalorder %s168_s13, 0  ;;  %234 = sbr.rel (%p231_p10) target bundleno = 460 (0x1cc), region = 44 }
  0x15   : > { %s661_s18 = sshll.u32 (!%p231_p10), %s891_s24, 3  ;;  %s257_s19 = sand.u32 (!%p231_p10), 1, %s883_s22  }
  0x16   : > { %s1016_s15 = scalar_select %p169_p11, %s887_s23, %s171_s14  }
  0x17   : > { %p261_p12 = scmp.lt.s32.totalorder (!%p231_p10), %s661_s18, 31  ;;  %s1025_s20 = sshll.u32 (!%p231_p10), %s257_s19, 6 }
  0x18   : > { %s1201_s0 = sld [smem:[#allocation9_spill]] (!%p231_p10)  ;;  %s1055_s13 = scalar_lea.vmem (!%p231_p10), [#allocation6], %s1025_s20 }
  0x19   : > { %v276_v0 = vld [vmem:[%s1200_s1] sm:$0xf]  ;;  %vm302_vm0 = vcmask 1043456   ;;  %s1216_s18 = smov (!%p261_p12, %s661_s18), 31  ;;  %vm277_vm1 = vcmask 31744   ;;  %p672_p13 = scmp.ne.s32.totalorder %s895_s25, 0 }
  0x1a   : > { %684 = vmatpush.msk.msra.mxu2 %vm302_vm0, %v276_v0  ;;  %685 = vmatpush.msk.msra.mxu3 %vm302_vm0, %v276_v0  ;;  %s662_s29 = sshll.u32 %s1216_s18, 3  ;;  %p673_p0 = scmp.ne.s32.totalorder (!%p672_p13), %s891_s24, 0 }
  0x1b   : > { %663 = vmatpush.msk.msra.mxu0 %vm302_vm0, %v276_v0  ;;  %683 = vmatpush.msk.msra.mxu1 %vm302_vm0, %v276_v0 }
  0x1e   : > { %s264_s12 = scalar_lea.vmem %s1201_s0, %s662_s29 }
  0x1f   : > { %v272_v1 = vld [vmem:[%s264_s12 + $0x20] sm:$0xff]  ;;  %v274_v2 = vld [vmem:[%s264_s12 + $0x30] sm:$0xff]  ;;  %v273_v5 = vld [vmem:[%s264_s12 + $0x28] sm:$0xff] }
  0x20   : > { %v268_v3 = vld [vmem:[%s264_s12] sm:$0xff]  ;;  %668 = vmatmul.msk.f32.vlgmr.msra.gmra.mxu2 %vm277_vm1, %v272_v1  ;;  %670 = vmatmul.msk.f32.vlgmr.msra.gmra.mxu3 %vm277_vm1, %v274_v2  ;;  %v270_v4 = vld [vmem:[%s264_s12 + $0x10] sm:$0xff]  ;;  %v275_v6 = vld [vmem:[%s264_s12 + $0x38] sm:$0xff] }
  0x21   : > { %664 = vmatmul.msk.f32.vlgmr.msra.gmra.mxu0 %vm277_vm1, %v268_v3  ;;  %666 = vmatmul.msk.f32.vlgmr.msra.gmra.mxu1 %vm277_vm1, %v270_v4  ;;  %v269_v7 = vld [vmem:[%s264_s12 + $0x8] sm:$0xff]  ;;  %v271_v8 = vld [vmem:[%s264_s12 + $0x18] sm:$0xff] }
  0x28   : > { %669 = vmatmul.msk.f32.gmra.mxu2 %vm277_vm1, %v273_v5  ;;  %671 = vmatmul.msk.f32.gmra.mxu3 %vm277_vm1, %v275_v6 }
  0x29   : > { %665 = vmatmul.msk.f32.gmra.mxu0 %vm277_vm1, %v269_v7  ;;  %667 = vmatmul.msk.f32.gmra.mxu1 %vm277_vm1, %v271_v8 }
  0x9e   : > { %v1038_v9 = vpop.f32.mrf.mxu0  ;;  %v1040_v10 = vpop.f32.mrf.mxu1 }
  0xa3   : > { %v1042_v11 = vpop.f32.mrf.mxu2  ;;  %v1044_v12 = vpop.f32.mrf.mxu3 }
  0xa6   : > { %v1046_v13 = vpop.f32.mrf.mxu0  ;;  %v1048_v14 = vpop.f32.mrf.mxu1 }
  0xa7   : > { %350 = sbr.rel (%p672_p13) target bundleno = 259 (0x103), region = 48 }
  0xab   : > { %v1050_v15 = vpop.f32.mrf.mxu2  ;;  %v1052_v16 = vpop.f32.mrf.mxu3 }
  0xac   : > { %354 = sbr.rel (%p673_p0) target bundleno = 180 (0xb4), region = 52 }
  0xb1   : > { %v909_v17 = vmov 0.0  }
  0xb2   : > { %355 = vst [vmem:[#allocation2] sm:$0x1] %v909_v17 }
  0xb3   : > { %356 = vst [vmem:[#allocation3] sm:$0x1] %v909_v17 }
  0xb4 PF: > { %s674_s14 = sshll.u32 %s891_s24, 6  ;;  %v358_v18 = vlaneseq  ;;  %p675_p1 = scmp.ne.s32.totalorder %s891_s24, 3 }
  0xb5   : > { %v367_v20 = vstv %s674_s14 }
  0xb6   : > { %v359_v19 = vshrl.u32 %v358_v18, 7 }
  0xb8   : > { %v360_v21 = vadd.s32 8, %v359_v19  ;;  %v361_v22 = vadd.s32 16, %v359_v19  ;;  %v362_v23 = vadd.s32 24, %v359_v19  ;;  %v363_v24 = vadd.s32 32, %v359_v19 }
  0xb9   : > { %v364_v25 = vadd.s32 40, %v359_v19  ;;  %v365_v26 = vadd.s32 48, %v359_v19  ;;  %v368_v27 = vadd.s32 %v367_v20, %v359_v19  ;;  %v366_v32 = vadd.s32 56, %v359_v19  ;;  %v392_v18 = vld [vmem:[#allocation2] sm:$0x1] }
  0xba   : > { %v369_v28 = vadd.s32 %v367_v20, %v360_v21  ;;  %v370_v29 = vadd.s32 %v367_v20, %v361_v22  ;;  %v371_v30 = vadd.s32 %v367_v20, %v362_v23  ;;  %v372_v31 = vadd.s32 %v367_v20, %v363_v24  ;;  %v408_v23 = vld [vmem:[#allocation3] sm:$0x1] }
  0xbb   : > { %vm376_vm2 = vcmp.lt.s32.totalorder %v368_v27, 200  ;;  %v373_v33 = vadd.s32 %v367_v20, %v364_v25  ;;  %v374_v35 = vadd.s32 %v367_v20, %v365_v26  ;;  %v375_v38 = vadd.s32 %v367_v20, %v366_v32 }
  0xbc   : > { %vm377_vm3 = vcmp.lt.s32.totalorder %v369_v28, 200  ;;  %vm378_vm4 = vcmp.lt.s32.totalorder %v370_v29, 200  ;;  %vm379_vm5 = vcmp.lt.s32.totalorder %v371_v30, 200  ;;  %v384_v34 = vsel %vm376_vm2, %v1038_v9, 0.0 }
  0xbd   : > { %vm380_vm6 = vcmp.lt.s32.totalorder %v372_v31, 200  ;;  %v385_v36 = vsel %vm377_vm3, %v1046_v13, 0.0  ;;  %v386_v37 = vsel %vm378_vm4, %v1040_v10, 0.0  ;;  %v387_v39 = vsel %vm379_vm5, %v1048_v14, 0.0 }
  0xbe   : > { %v393_v40 = vadd.f32 %v385_v36, %v384_v34  ;;  %vm381_vm7 = vcmp.lt.s32.totalorder %v373_v33, 200  ;;  %v409_v41 = vmul.f32 %v384_v34, %v384_v34  ;;  %v410_v42 = vmul.f32 %v385_v36, %v385_v36 }
  0xbf   : > { %v411_v43 = vmul.f32 %v386_v37, %v386_v37  ;;  %v388_v44 = vsel %vm380_vm6, %v1042_v11, 0.0  ;;  %vm382_vm8 = vcmp.lt.s32.totalorder %v374_v35, 200  ;;  %v412_v46 = vmul.f32 %v387_v39, %v387_v39 }
  0xc0   : > { %v394_v45 = vadd.f32 %v393_v40, %v386_v37  ;;  %v417_v47 = vadd.f32 %v410_v42, %v409_v41  ;;  %v389_v48 = vsel %vm381_vm7, %v1050_v15, 0.0  ;;  %vm383_vm9 = vcmp.lt.s32.totalorder %v375_v38, 200 }
  0xc1   : > { %v413_v50 = vmul.f32 %v388_v44, %v388_v44  ;;  %v390_v52 = vsel %vm382_vm8, %v1044_v12, 0.0  ;;  %v414_v54 = vmul.f32 %v389_v48, %v389_v48  ;;  %v391_v56 = vsel %vm383_vm9, %v1052_v16, 0.0 }
  0xc2   : > { %v395_v49 = vadd.f32 %v394_v45, %v387_v39  ;;  %v418_v51 = vadd.f32 %v417_v47, %v411_v43  ;;  %v415_v58 = vmul.f32 %v390_v52, %v390_v52  ;;  %v416_v61 = vmul.f32 %v391_v56, %v391_v56 }
  0xc4   : > { %v396_v53 = vadd.f32 %v395_v49, %v388_v44  ;;  %v419_v55 = vadd.f32 %v418_v51, %v412_v46 }
  0xc6   : > { %v397_v57 = vadd.f32 %v396_v53, %v389_v48  ;;  %v420_v59 = vadd.f32 %v419_v55, %v413_v50 }
  0xc8   : > { %v398_v60 = vadd.f32 %v397_v57, %v390_v52  ;;  %v421_v62 = vadd.f32 %v420_v59, %v414_v54 }
  0xca   : > { %v399_v63 = vadd.f32 %v398_v60, %v391_v56  ;;  %v422_v0 = vadd.f32 %v421_v62, %v415_v58 }
  0xcc   : > { %v400_v1 = vrot.slane %v399_v63, 4  ;;  %v423_v2 = vadd.f32 %v422_v0, %v416_v61 }
  0xce   : > { %v401_v3 = vadd.f32 %v400_v1, %v399_v63  ;;  %v424_v4 = vrot.slane %v423_v2, 4 }
  0xd0   : > { %v402_v5 = vrot.slane %v401_v3, 2  ;;  %v425_v6 = vadd.f32 %v424_v4, %v423_v2 }
  0xd2   : > { %v403_v7 = vadd.f32 %v402_v5, %v401_v3  ;;  %v426_v8 = vrot.slane %v425_v6, 2 }
  0xd4   : > { %v404_v17 = vrot.slane %v403_v7, 1  ;;  %v427_v19 = vadd.f32 %v426_v8, %v425_v6 }
  0xd6   : > { %v405_v20 = vadd.f32 %v404_v17, %v403_v7  ;;  %v428_v21 = vrot.slane %v427_v19, 1 }
  0xd8   : > { %v406_v22 = vadd.f32 %v405_v20, %v392_v18  ;;  %v429_v24 = vadd.f32 %v428_v21, %v427_v19  ;;  %435 = sbr.rel (%p675_p1) target bundleno = 259 (0x103), region = 56 }
  0xda   : > { %407 = vst [vmem:[#allocation2] sm:$0x1] %v406_v22  ;;  %v430_v25 = vadd.f32 %v429_v24, %v408_v23 }
  0xdc   : > { %431 = vst [vmem:[#allocation3] sm:$0x1] %v430_v25 }
  0xdd   : > { %v453_v39 = vld [vmem:[%s1191_s2] sm:$0x1] }
  0xde   : > { %v456_v42 = vld [vmem:[%s1192_s3] sm:$0x1] }
  0xe1   : > { %v436_v26 = vld [vmem:[#allocation2] sm:$0x1] }
  0xe2   : > { %v437_v28 = vmul.f32 0.005, %v436_v26 }
  0xe3   : > { %v438_v27 = vld [vmem:[#allocation3] sm:$0x1] }
  0xe4   : > { %v439_v29 = vmul.f32 0.005, %v438_v27  ;;  %v440_v30 = vmul.f32 %v437_v28, %v437_v28 }
  0xe6   : > { %v441_v31 = vsub.f32 %v439_v29, %v440_v30 }
  0xe8   : > { %v442_v32 = vadd.f32 1e-05, %v441_v31 }
  0xea   : > { %808 = vrsqrt.f32 %v442_v32  ;;  %vm449_vm10 = vweird.f32 %v442_v32 }
  0xf0   : > { %v809_v33 = vpop.eup %808 }
  0xf1   : > { %v444_v34 = vmul.f32 %v809_v33, %v442_v32  ;;  %vm450_vm11 = vweird.f32 %v809_v33 }
  0xf2   : > { %vm451_vm12 = vmor %vm449_vm10, %vm450_vm11 }
  0xf3   : > { %v445_v35 = vmul.f32 %v809_v33, %v444_v34 }
  0xf5   : > { %v446_v36 = vmul.f32 0.5, %v445_v35 }
  0xf7   : > { %v447_v37 = vsub.f32 1.5, %v446_v36 }
  0xf9   : > { %v448_v38 = vmul.f32 %v809_v33, %v447_v37 }
  0xfb   : > { %v452_v40 = vsel %vm451_vm12, %v809_v33, %v448_v38 }
  0xfc   : > { %v454_v41 = vmul.f32 %v453_v39, %v452_v40 }
  0xfe   : > { %455 = vst [vmem:[#allocation4] sm:$0x1] %v454_v41  ;;  %v457_v43 = vmul.f32 %v454_v41, %v437_v28 }
 0x100   : > { %v458_v44 = vsub.f32 %v456_v42, %v457_v43 }
 0x102   : > { %459 = vst [vmem:[#allocation5] sm:$0x1] %v458_v44 }
 0x103 PF: > { %p676_p2 = scmp.ne.s32.totalorder %s895_s25, 1 }
 0x105   : > { %463 = sbr.rel (%p676_p2) target bundleno = 442 (0x1ba), region = 60 }
 0x10a   : > { %v511_v45 = vld [vmem:[%s1193_s4 + $0x78] sm:$0xff]  ;;  %v510_v46 = vld [vmem:[%s1193_s4 + $0x70] sm:$0xff]  ;;  %v509_v47 = vld [vmem:[%s1193_s4 + $0x68] sm:$0xff] }
 0x10b   : > { %687 = vmatpush.msra.mxu2 %v511_v45  ;;  %688 = vmatpush.msra.mxu3 %v511_v45  ;;  %v508_v48 = vld [vmem:[%s1193_s4 + $0x60] sm:$0xff]  ;;  %v507_v49 = vld [vmem:[%s1193_s4 + $0x58] sm:$0xff]  ;;  %v506_v50 = vld [vmem:[%s1193_s4 + $0x50] sm:$0xff] }
 0x10c   : > { %516 = vmatpush.msra.mxu0 %v511_v45  ;;  %686 = vmatpush.msra.mxu1 %v511_v45  ;;  %v505_v51 = vld [vmem:[%s1193_s4 + $0x48] sm:$0xff]  ;;  %v504_v52 = vld [vmem:[%s1193_s4 + $0x40] sm:$0xff]  ;;  %v503_v53 = vld [vmem:[%s1193_s4 + $0x38] sm:$0xff] }
 0x10d   : > { %690 = vmatpush.msra.mxu2 %v510_v46  ;;  %691 = vmatpush.msra.mxu3 %v510_v46  ;;  %v502_v54 = vld [vmem:[%s1193_s4 + $0x30] sm:$0xff]  ;;  %v810_v55 = vld [vmem:[#allocation4] ss:$0 sm:$0xff]  ;;  %v501_v56 = vld [vmem:[%s1193_s4 + $0x28] sm:$0xff] }
 0x10e   : > { %517 = vmatpush.msra.mxu0 %v510_v46  ;;  %689 = vmatpush.msra.mxu1 %v510_v46  ;;  %v500_v57 = vld [vmem:[%s1193_s4 + $0x20] sm:$0xff]  ;;  %v472_v58 = vmul.f32 %v810_v55, %v1042_v11  ;;  %v474_v60 = vmul.f32 %v810_v55, %v1044_v12  ;;  %v499_v61 = vld [vmem:[%s1193_s4 + $0x18] sm:$0xff]  ;;  %v468_v62 = vmul.f32 %v810_v55, %v1038_v9  ;;  %v498_v11 = vld [vmem:[%s1193_s4 + $0x10] sm:$0xff] }
 0x10f   : > { %693 = vmatpush.msra.mxu2 %v509_v47  ;;  %694 = vmatpush.msra.mxu3 %v509_v47  ;;  %v811_v59 = vld [vmem:[#allocation5] ss:$0 sm:$0xff]  ;;  %v470_v63 = vmul.f32 %v810_v55, %v1040_v10  ;;  %v497_v1 = vld [vmem:[%s1193_s4 + $0x8] sm:$0xff]  ;;  %v473_v5 = vmul.f32 %v810_v55, %v1050_v15  ;;  %v475_v6 = vmul.f32 %v810_v55, %v1052_v16 }
 0x110   : > { %518 = vmatpush.msra.mxu0 %v509_v47  ;;  %692 = vmatpush.msra.mxu1 %v509_v47  ;;  %v484_v12 = vadd.f32 %v811_v59, %v472_v58  ;;  %v486_v0 = vadd.f32 %v811_v59, %v474_v60  ;;  %v480_v9 = vadd.f32 %v811_v59, %v468_v62  ;;  %v496_v2 = vld [vmem:[%s1193_s4] sm:$0xff] }
 0x111   : > { %696 = vmatpush.msra.mxu2 %v508_v48  ;;  %697 = vmatpush.msra.mxu3 %v508_v48  ;;  %v482_v10 = vadd.f32 %v811_v59, %v470_v63  ;;  %v469_v17 = vmul.f32 %v810_v55, %v1046_v13  ;;  %v471_v18 = vmul.f32 %v810_v55, %v1048_v14  ;;  %v812_v14 = vld [vmem:[%s1194_s5] ss:$0 sm:$0xff] }
 0x112   : > { %519 = vmatpush.msra.mxu0 %v508_v48  ;;  %695 = vmatpush.msra.mxu1 %v508_v48  ;;  %v492_v3 = vmax.f32 %v484_v12, 0.0  ;;  %v494_v4 = vmax.f32 %v486_v0, 0.0  ;;  %v488_v7 = vmax.f32 %v480_v9, 0.0  ;;  %v485_v19 = vadd.f32 %v811_v59, %v473_v5 }
 0x113   : > { %699 = vmatpush.msra.mxu2 %v507_v49  ;;  %700 = vmatpush.msra.mxu3 %v507_v49  ;;  %v490_v8 = vmax.f32 %v482_v10, 0.0  ;;  %v487_v20 = vadd.f32 %v811_v59, %v475_v6  ;;  %v481_v15 = vadd.f32 %v811_v59, %v469_v17  ;;  %v483_v16 = vadd.f32 %v811_v59, %v471_v18 }
 0x114   : > { %520 = vmatpush.msra.mxu0 %v507_v49  ;;  %698 = vmatpush.msra.mxu1 %v507_v49  ;;  %v493_v21 = vmax.f32 %v485_v19, 0.0 }
 0x115   : > { %702 = vmatpush.msra.mxu2 %v506_v50  ;;  %703 = vmatpush.msra.mxu3 %v506_v50  ;;  %v495_v22 = vmax.f32 %v487_v20, 0.0  ;;  %v489_v23 = vmax.f32 %v481_v15, 0.0  ;;  %v491_v13 = vmax.f32 %v483_v16, 0.0 }
 0x116   : > { %521 = vmatpush.msra.mxu0 %v506_v50  ;;  %701 = vmatpush.msra.mxu1 %v506_v50 }
 0x117   : > { %705 = vmatpush.msra.mxu2 %v505_v51  ;;  %706 = vmatpush.msra.mxu3 %v505_v51 }
 0x118   : > { %522 = vmatpush.msra.mxu0 %v505_v51  ;;  %704 = vmatpush.msra.mxu1 %v505_v51 }
 0x119   : > { %708 = vmatpush.msra.mxu2 %v504_v52  ;;  %709 = vmatpush.msra.mxu3 %v504_v52 }
 0x11a   : > { %523 = vmatpush.msra.mxu0 %v504_v52  ;;  %707 = vmatpush.msra.mxu1 %v504_v52 }
 0x11b   : > { %711 = vmatpush.msra.mxu2 %v503_v53  ;;  %712 = vmatpush.msra.mxu3 %v503_v53 }
 0x11c   : > { %524 = vmatpush.msra.mxu0 %v503_v53  ;;  %710 = vmatpush.msra.mxu1 %v503_v53 }
 0x11d   : > { %714 = vmatpush.msra.mxu2 %v502_v54  ;;  %715 = vmatpush.msra.mxu3 %v502_v54 }
 0x11e   : > { %525 = vmatpush.msra.mxu0 %v502_v54  ;;  %713 = vmatpush.msra.mxu1 %v502_v54 }
 0x11f   : > { %717 = vmatpush.msra.mxu2 %v501_v56  ;;  %718 = vmatpush.msra.mxu3 %v501_v56 }
 0x120   : > { %526 = vmatpush.msra.mxu0 %v501_v56  ;;  %716 = vmatpush.msra.mxu1 %v501_v56 }
 0x121   : > { %720 = vmatpush.msra.mxu2 %v500_v57  ;;  %721 = vmatpush.msra.mxu3 %v500_v57 }
 0x122   : > { %527 = vmatpush.msra.mxu0 %v500_v57  ;;  %719 = vmatpush.msra.mxu1 %v500_v57 }
 0x123   : > { %723 = vmatpush.msra.mxu2 %v499_v61  ;;  %724 = vmatpush.msra.mxu3 %v499_v61 }
 0x124   : > { %528 = vmatpush.msra.mxu0 %v499_v61  ;;  %722 = vmatpush.msra.mxu1 %v499_v61 }
 0x125   : > { %726 = vmatpush.msra.mxu2 %v498_v11  ;;  %727 = vmatpush.msra.mxu3 %v498_v11 }
 0x126   : > { %529 = vmatpush.msra.mxu0 %v498_v11  ;;  %725 = vmatpush.msra.mxu1 %v498_v11 }
 0x127   : > { %729 = vmatpush.msra.mxu2 %v497_v1  ;;  %730 = vmatpush.msra.mxu3 %v497_v1 }
 0x128   : > { %530 = vmatpush.msra.mxu0 %v497_v1  ;;  %728 = vmatpush.msra.mxu1 %v497_v1 }
 0x129   : > { %732 = vmatpush.msra.mxu2 %v496_v2  ;;  %733 = vmatpush.msra.mxu3 %v496_v2 }
 0x12a   : > { %544 = vmatmul.f32.vlgmr.msra.gmra.mxu2 %v492_v3  ;;  %550 = vmatmul.f32.vlgmr.msra.gmra.mxu3 %v494_v4 }
 0x12b   : > { %531 = vmatpush.msra.mxu0 %v496_v2  ;;  %731 = vmatpush.msra.mxu1 %v496_v2 }
 0x12c   : > { %532 = vmatmul.f32.vlgmr.msra.gmra.mxu0 %v488_v7  ;;  %538 = vmatmul.f32.vlgmr.msra.gmra.mxu1 %v490_v8 }
 0x132   : > { %547 = vmatmul.f32.gmra.mxu2 %v493_v21  ;;  %553 = vmatmul.f32.gmra.mxu3 %v495_v22 }
 0x134   : > { %535 = vmatmul.f32.gmra.mxu0 %v489_v23  ;;  %541 = vmatmul.f32.gmra.mxu1 %v491_v13 }
 0x1a9   : > { %v533_v24 = vpop.f32.mrf.mxu0  ;;  %v539_v25 = vpop.f32.mrf.mxu1 }
 0x1aa   : > { %v534_v26 = vadd.f32 %v812_v14, %v533_v24  ;;  %v540_v27 = vadd.f32 %v812_v14, %v539_v25 }
 0x1ac   : > { %557 = vst [vmem:[%s1055_s13] sm:$0xff] %v534_v26 }
 0x1ad   : > { %559 = vst [vmem:[%s1055_s13 + $0x10] sm:$0xff] %v540_v27  ;;  %v545_v28 = vpop.f32.mrf.mxu2  ;;  %v551_v29 = vpop.f32.mrf.mxu3 }
 0x1ae   : > { %v546_v30 = vadd.f32 %v812_v14, %v545_v28  ;;  %v552_v31 = vadd.f32 %v812_v14, %v551_v29 }
 0x1b0   : > { %561 = vst [vmem:[%s1055_s13 + $0x20] sm:$0xff] %v546_v30 }
 0x1b1   : > { %563 = vst [vmem:[%s1055_s13 + $0x30] sm:$0xff] %v552_v31  ;;  %v536_v32 = vpop.f32.mrf.mxu0  ;;  %v542_v33 = vpop.f32.mrf.mxu1 }
 0x1b2   : > { %v537_v34 = vadd.f32 %v812_v14, %v536_v32  ;;  %v543_v35 = vadd.f32 %v812_v14, %v542_v33 }
 0x1b4   : > { %558 = vst [vmem:[%s1055_s13 + $0x8] sm:$0xff] %v537_v34 }
 0x1b5   : > { %560 = vst [vmem:[%s1055_s13 + $0x18] sm:$0xff] %v543_v35  ;;  %v548_v36 = vpop.f32.mrf.mxu2  ;;  %v554_v37 = vpop.f32.mrf.mxu3 }
 0x1b6   : > { %v549_v38 = vadd.f32 %v812_v14, %v548_v36  ;;  %v555_v39 = vadd.f32 %v812_v14, %v554_v37 }
 0x1b8   : > { %562 = vst [vmem:[%s1055_s13 + $0x28] sm:$0xff] %v549_v38 }
 0x1b9   : > { %564 = vst [vmem:[%s1055_s13 + $0x38] sm:$0xff] %v555_v39 }
 0x1ba PF: > { %s573_s18 = smul.u32 %s891_s24, %s895_s25  ;;  %s579_s20 = sshll.u32 %s1055_s13, 4  ;;  %s580_s20 = int_to_ptr.vmem [resolvable:$true] %s579_s20 }
 0x1bb   : > { %s566_s16 = scalar_lea.sflag [#allocation7], %s257_s19  ;;  %s833_s25 = scalar_lea.hbm %s1195_s6, 256 }
 0x1bc   : > { %s682_s29 = sshll.u32 %s573_s18, 6 }
 0x1bd   : > { %s578_s12 = scalar_lea.hbm %s1195_s6, %s682_s29 }
 0x1be   : > { %s581_s14 = sshll.u32 %s578_s12, 4  ;;  %s582_s14 = int_to_ptr.hbm [resolvable:$true] %s581_s14 }
 0x1bf   : > { %s827_s17 = sshra.s32 %s582_s14, 4  ;;  %s828_s17 = int_to_ptr.hbm [resolvable:$true] %s827_s17 }
 0x1c0   : > { %s829_s0 = scalar_lea.hbm %s828_s17, 64  ;;  %p834_p7 = scmp.lt.s32.totalorder %s828_s17, %s1195_s6 }
 0x1c1   : > { %p830_p3 = scmp.ne.s32.totalorder %s828_s17, %s829_s0  ;;  %p835_p9 = scmp.lt.s32.totalorder %s833_s25, %s829_s0 }
 0x1c3   : > { %p831_p4 = pnand %p830_p3, %p1000_p6  ;;  %p836_p10 = por %p835_p9, %p834_p7 }
 0x1c5   : > { %p832_p5 = pneg %p831_p4 }
 0x1c7   : > { %p837_p11 = pnand %p836_p10, %p832_p5 }
 0x1c9   : > { %840 = shalt.err (!%p837_p11)
}
 0x1ca   : > { %s910_s19 = smov 128   ;;  %s911_s29 = smov 8  }
 0x1cb   : > { %734 = dma.vmem_to_hbm [thread:$0]  (%p1000_p6), %s580_s20, 1024, %s582_s14, %s566_s16, %s910_s19, %s910_s19, %s911_s29  }
 0x1cc PF: > { %p740_p12 = scmp.ge.s32.totalorder %s907_s28, 2  ;;  %s596_s1 = sand.u32 1, %s879_s21  }
 0x1cd   : > { %s597_s30 = scalar_lea.sflag [#allocation7], %s596_s1 }
 0x1ce   : > { %p737_p13 = pnand %p740_p12, %p1007_p8 }
 0x1d0   : > { %p738_p0 = pneg %p737_p13 }
 0x1d2   : > { %874 = dma.done.wait (%p738_p0), %s597_s30, 1024  }
 0x1d3   : > { %876 = vsyncadd (%p738_p0), %s597_s30, 4294966272  ;;  %s19_s28 = sadd.s32 1, %s907_s28   ;;  %s1202_s21 = smov %s883_s22 }
 0x1d4   : > { %p16_p1 = scmp.ge.s32.totalorder %s19_s28, 10   ;;  %s1203_s22 = smov %s887_s23 }
 0x1d5   : > { %s1204_s23 = smov %s1016_s15  ;;  %s1205_s24 = smov %s899_s26 }
 0x1d6   : > { %s1206_s25 = smov %s903_s27  ;;  %s1207_s26 = smov %s1210_s7 }
 0x1d7   : > { %s1208_s27 = smov %s1214_s8  ;;  %18 = sbr.rel (!%p16_p1) target bundleno = 8 (0x8), region = 95 }
 0x1dc   :  { %603 = vsyncpa [#allocation7], 1 }
 0x1dd   :  { %605 = vsyncpa [#allocation7 + $0x1], 1 }

</bundles_post_ra>
